<compile_context>
chip_gen: v5e
topology: v5e:2x2
jax: 0.10.0
libtpu: 0.0.40
codegen_flags: <defaults>
</compile_context>

<pallas_src>
import functools

import jax
import jax.numpy as jnp
from jax.experimental import pallas as pl
from jax.experimental.pallas import tpu as pltpu


def _round_up(x: int, m: int) -> int:
    return ((x + m - 1) // m) * m


def _linear_kernel(x_ref, w_ref, b_ref, o_ref):
    # One M-tile: (TM, K) @ (K, E_pad) on the MXU, bias add on the VPU.
    acc = jnp.dot(x_ref[...], w_ref[...], preferred_element_type=jnp.float32)
    o_ref[...] = (acc + b_ref[...]).astype(o_ref.dtype)


def patch_tokenizer_forward(x, weight, bias, *, patch_size, tm=512):
    """
    x:      (bs, l, c) float32
    weight: (emb_dim, c*patch_size)  -- PyTorch nn.Linear weight layout
    bias:   (emb_dim,)
    returns (bs, l // patch_size, emb_dim)
    """
    bs, length, c = x.shape
    assert length % patch_size == 0, "Sequence not divisible by patch_size"
    n_patches = length // patch_size
    emb_dim = weight.shape[0]
    k = c * patch_size
    m = bs * n_patches

    # --- zero-copy patch extraction in native (bs, l, c) layout ---
    # x[b, i*p + t, ch] -> xp[b*n + i, t*c + ch]   (pure row-major reshape)
    xp = x.reshape(m, k)

    # --- permute the small weight instead of transposing the activations ---
    # old feature index ch*p + t  ->  new feature index t*c + ch
    w = jnp.transpose(weight)                      # (K, E), row index ch*p + t
    w = w.reshape(c, patch_size, emb_dim)          # [ch, t, :]
    w = jnp.transpose(w, (1, 0, 2)).reshape(k, emb_dim)   # row index t*c + ch
    b = bias.reshape(1, emb_dim)

    # --- lane-dense output: pad E up to a multiple of 128 ---
    e_pad = _round_up(emb_dim, 128)
    if e_pad != emb_dim:
        w = jnp.pad(w, ((0, 0), (0, e_pad - emb_dim)))
        b = jnp.pad(b, ((0, 0), (0, e_pad - emb_dim)))

    # --- tile M; pad rows so the grid divides exactly ---
    tm_eff = min(tm, _round_up(m, 8))
    m_pad = _round_up(m, tm_eff)
    if m_pad != m:
        xp = jnp.pad(xp, ((0, m_pad - m), (0, 0)))

    grid = (m_pad // tm_eff,)
    cost = pl.CostEstimate(
        flops=2 * m_pad * k * e_pad,
        transcendentals=0,
        bytes_accessed=4 * (m_pad * k + k * e_pad + e_pad + m_pad * e_pad),
    )

    out = pl.pallas_call(
        _linear_kernel,
        out_shape=jax.ShapeDtypeStruct((m_pad, e_pad), x.dtype),
        grid=grid,
        in_specs=[
            pl.BlockSpec((tm_eff, k), lambda i: (i, 0)),   # stream M tiles of X
            pl.BlockSpec((k, e_pad), lambda i: (0, 0)),    # W resident
            pl.BlockSpec((1, e_pad), lambda i: (0, 0)),    # bias resident
        ],
        out_specs=pl.BlockSpec((tm_eff, e_pad), lambda i: (i, 0)),
        compiler_params=pltpu.CompilerParams(
            dimension_semantics=("parallel",),
        ),
        cost_estimate=cost,
    )(xp, w, b)

    # Strip padding (fuses under jit) and restore (bs, n_patches, emb_dim).
    return out[:m, :emb_dim].reshape(bs, n_patches, emb_dim)


if __name__ == "__main__":
    # Module-default small shapes: channels=2, patch_size=36, emb_dim=192,
    # sequence length l=72 (2 patches), batch=2.
    bs, channels, patch_size, emb_dim = 2, 2, 36, 192
    length = 2 * patch_size
    k = channels * patch_size

    key = jax.random.PRNGKey(0)
    kx, kw, kb = jax.random.split(key, 3)

    x = jax.random.normal(kx, (bs, length, channels), dtype=jnp.float32)
    bound = 1.0 / (k ** 0.5)
    weight = jax.random.uniform(kw, (emb_dim, k), jnp.float32, -bound, bound)
    bias = jax.random.uniform(kb, (emb_dim,), jnp.float32, -bound, bound)

    fwd = jax.jit(functools.partial(patch_tokenizer_forward, patch_size=patch_size))
    out = jax.block_until_ready(fwd(x, weight, bias))

    # Pure-JAX reference following the original PyTorch permute/view chain.
    n = length // patch_size
    xp_ref = jnp.transpose(x, (0, 2, 1)).reshape(bs, channels, n, patch_size)
    xp_ref = jnp.transpose(xp_ref, (0, 2, 1, 3)).reshape(bs, n, k)
    ref = jnp.einsum(
        "bnk,ek->bne", xp_ref, weight, precision=jax.lax.Precision.HIGHEST
    ) + bias

    assert out.shape == (bs, n, emb_dim)
    assert jnp.allclose(out, ref, atol=1e-5, rtol=1e-5), float(
        jnp.max(jnp.abs(out - ref))
    )

    print("KERNEL_OK")
</pallas_src>

<mosaic_0001>
module attributes {stable_mosaic.version = 11 : i64} {
  func.func @_linear_kernel(%arg0: i32, %arg1: memref<8x72xf32, #tpu.memory_space<vmem>>, %arg2: memref<72x256xf32, #tpu.memory_space<vmem>>, %arg3: memref<1x256xf32, #tpu.memory_space<vmem>>, %arg4: memref<8x256xf32, #tpu.memory_space<vmem>>) attributes {dimension_semantics = [#tpu.dimension_semantics<parallel>], iteration_bounds = array<i64: 1>, scalar_prefetch = 0 : i64, scratch_operands = 0 : i64, tpu.core_type = #tpu.core_type<tc>, window_params = [{transform_indices = @transform_0, window_bounds = array<i64: 8, 72>}, {pipeline_mode = #tpu.pipeline_mode<synchronous>, transform_indices = @transform_1, window_bounds = array<i64: 72, 256>}, {pipeline_mode = #tpu.pipeline_mode<synchronous>, transform_indices = @transform_2, window_bounds = array<i64: 1, 256>}, {transform_indices = @transform_3, window_bounds = array<i64: 8, 256>}]} {
    %c0 = arith.constant 0 : index
    %c0_0 = arith.constant 0 : index
    %0 = vector.load %arg1[%c0, %c0_0] : memref<8x72xf32, #tpu.memory_space<vmem>>, vector<8x72xf32>
    %c0_1 = arith.constant 0 : index
    %c0_2 = arith.constant 0 : index
    %1 = vector.load %arg2[%c0_1, %c0_2] : memref<72x256xf32, #tpu.memory_space<vmem>>, vector<72x256xf32>
    %cst = arith.constant dense<0.000000e+00> : vector<8x256xf32>
    %2 = tpu.matmul %0, %1, %cst {dimension_numbers = #tpu.dot_dimension_numbers<[1], [0], [0], [1], [0, 0, 1, 1], [], []>} : vector<8x72xf32>, vector<72x256xf32>, vector<8x256xf32> -> vector<8x256xf32>
    %c0_3 = arith.constant 0 : index
    %c0_4 = arith.constant 0 : index
    %3 = vector.load %arg3[%c0_3, %c0_4] : memref<1x256xf32, #tpu.memory_space<vmem>>, vector<1x256xf32>
    %4 = vector.broadcast %3 : vector<1x256xf32> to vector<8x256xf32>
    %5 = arith.addf %2, %4 : vector<8x256xf32>
    %c0_5 = arith.constant 0 : index
    %c0_6 = arith.constant 0 : index
    %6 = vector.load %arg4[%c0_5, %c0_6] : memref<8x256xf32, #tpu.memory_space<vmem>>, vector<8x256xf32>
    tpu.vector_store %arg4[%c0_5, %c0_6], %5 {strides = array<i32>} : memref<8x256xf32, #tpu.memory_space<vmem>>, vector<8x256xf32>,
    return
  }
  func.func @transform_0(%arg0: i32) -> (i32, i32) {
    %c0_i32 = arith.constant 0 : i32
    %c0_i32_0 = arith.constant 0 : i32
    return %arg0, %c0_i32 : i32, i32
  }
  func.func @transform_1(%arg0: i32) -> (i32, i32) {
    %c0_i32 = arith.constant 0 : i32
    %c0_i32_0 = arith.constant 0 : i32
    %c0_i32_1 = arith.constant 0 : i32
    return %c0_i32, %c0_i32_0 : i32, i32
  }
  func.func @transform_2(%arg0: i32) -> (i32, i32) {
    %c0_i32 = arith.constant 0 : i32
    %c0_i32_0 = arith.constant 0 : i32
    %c0_i32_1 = arith.constant 0 : i32
    return %c0_i32, %c0_i32_0 : i32, i32
  }
  func.func @transform_3(%arg0: i32) -> (i32, i32) {
    %c0_i32 = arith.constant 0 : i32
    %c0_i32_0 = arith.constant 0 : i32
    return %arg0, %c0_i32 : i32, i32
  }
}

</mosaic_0001>

<bundles_post_ra>
// kernel: patch_tokenizer_forward.1
= control target key start
LH: loop header
LB: loop body
LE: loop exit
PB: predicated region body
PF: predicated region fallthrough
CT: control target
= control target key end

     0   :  { %vm39_vm0 = vcmask 588800   ;;  %s177_s1 = inlined_call_operand.vmem [shape: f32[72,256], index: 1, kind: input, shape index: {}]   ;;  %s178_s0 = inlined_call_operand.vmem [shape: f32[8,72], index: 0, kind: input, shape index: {}]   ;;  %s179_s2 = inlined_call_operand.vmem [shape: f32[1,256], index: 2, kind: input, shape index: {}]   ;;  %s180_s3 = inlined_call_operand.vmem [shape: f32[8,256], index: 3, kind: output, shape index: {}]  }
   0x1   :  { %v31_v0 = vld [vmem:[%s177_s1 + $0x80] sm:$0xff]  ;;  %v32_v1 = vld [vmem:[%s177_s1 + $0x88] sm:$0xff]  ;;  %v29_v2 = vld [vmem:[%s177_s1 + $0x70] sm:$0xff] }
   0x2   :  { %50 = vmatpush.msra.mxu0 %v31_v0  ;;  %70 = vmatpush.msra.mxu1 %v32_v1  ;;  %v30_v3 = vld [vmem:[%s177_s1 + $0x78] sm:$0xff]  ;;  %v27_v4 = vld [vmem:[%s177_s1 + $0x60] sm:$0xff]  ;;  %v28_v5 = vld [vmem:[%s177_s1 + $0x68] sm:$0xff] }
   0x3   :  { %v25_v6 = vld [vmem:[%s177_s1 + $0x50] sm:$0xff]  ;;  %v26_v7 = vld [vmem:[%s177_s1 + $0x58] sm:$0xff]  ;;  %v23_v8 = vld [vmem:[%s177_s1 + $0x40] sm:$0xff] }
   0x4   :  { %51 = vmatpush.msra.mxu0 %v29_v2  ;;  %71 = vmatpush.msra.mxu1 %v30_v3  ;;  %v24_v9 = vld [vmem:[%s177_s1 + $0x48] sm:$0xff]  ;;  %v21_v10 = vld [vmem:[%s177_s1 + $0x30] sm:$0xff]  ;;  %v22_v11 = vld [vmem:[%s177_s1 + $0x38] sm:$0xff] }
   0x5   :  { %v19_v12 = vld [vmem:[%s177_s1 + $0x20] sm:$0xff]  ;;  %v20_v13 = vld [vmem:[%s177_s1 + $0x28] sm:$0xff]  ;;  %v17_v14 = vld [vmem:[%s177_s1 + $0x10] sm:$0xff] }
   0x6   :  { %52 = vmatpush.msra.mxu0 %v27_v4  ;;  %72 = vmatpush.msra.mxu1 %v28_v5  ;;  %v18_v15 = vld [vmem:[%s177_s1 + $0x18] sm:$0xff]  ;;  %v15_v16 = vld [vmem:[%s177_s1] sm:$0xff]  ;;  %v16_v17 = vld [vmem:[%s177_s1 + $0x8] sm:$0xff] }
   0x7   :  { %v14_v18 = vld [vmem:[%s178_s0] sm:$0xff] }
   0x8   :  { %53 = vmatpush.msra.mxu0 %v25_v6  ;;  %73 = vmatpush.msra.mxu1 %v26_v7  ;;  %v33_v19 = vld [vmem:[%s179_s2] sm:$0x3] }
   0x9   :  { %v35_v20 = vperm.slane %v33_v19, 0  ;;  %v36_v21 = vperm.slane %v33_v19, 1 }
   0xa   :  { %54 = vmatpush.msra.mxu0 %v23_v8  ;;  %74 = vmatpush.msra.mxu1 %v24_v9 }
   0xc   :  { %55 = vmatpush.msra.mxu0 %v21_v10  ;;  %75 = vmatpush.msra.mxu1 %v22_v11 }
   0xe   :  { %56 = vmatpush.msra.mxu0 %v19_v12  ;;  %76 = vmatpush.msra.mxu1 %v20_v13 }
  0x10   :  { %57 = vmatpush.msra.mxu0 %v17_v14  ;;  %77 = vmatpush.msra.mxu1 %v18_v15 }
  0x12   :  { %58 = vmatpush.msra.mxu0 %v15_v16  ;;  %78 = vmatpush.msra.mxu1 %v16_v17 }
  0x13   :  { %89 = vmatmul.msk.f32.vlgmr.msra.gmra.mxu0 %vm39_vm0, %v14_v18  ;;  %90 = vmatmul.msk.f32.vlgmr.msra.gmra.mxu1 %vm39_vm0, %v14_v18 }
  0x90   :  { %v60_v22 = vpop.f32.mrf.mxu0  ;;  %v80_v23 = vpop.f32.mrf.mxu1 }
  0x91   :  { %v61_v24 = vadd.f32 %v60_v22, %v35_v20  ;;  %v81_v25 = vadd.f32 %v80_v23, %v36_v21 }
  0x93   :  { %83 = vst [vmem:[%s180_s3] sm:$0xff] %v61_v24 }
  0x94   :  { %84 = vst [vmem:[%s180_s3 + $0x8] sm:$0xff] %v81_v25 }

</bundles_post_ra>
